<compile_context>
chip_gen: v5e
topology: v5e:2x2
jax: 0.10.0
libtpu: 0.0.40
codegen_flags: <defaults>
</compile_context>

<pallas_src>
import jax
import jax.numpy as jnp
from jax.experimental import pallas as pl
from jax.experimental.pallas import tpu as pltpu  # noqa: F401  (TPU backend)

# ----------------------------- mini-BERT config -----------------------------
VOCAB = 128
MAX_POS = 64
TYPE_VOCAB = 2
SEQ = 8          # "max_length"-style sequence length for this synthetic run
HIDDEN = 32
HEADS = 2
HEAD_DIM = HIDDEN // HEADS
INTER = 64
LAYERS = 2
EPS = 1e-12      # BERT LayerNorm eps

# row layout of the packed per-layer H-wide vector tensor (LAYERS, 9, HIDDEN)
_BQ, _BK, _BV, _BO, _G1, _B1, _C2, _G2, _B2 = range(9)


# ----------------------------- in-kernel helpers ----------------------------
def _layernorm(x, g, b):
    mu = jnp.mean(x, axis=-1, keepdims=True)
    d = x - mu
    var = jnp.mean(d * d, axis=-1, keepdims=True)
    return d * jax.lax.rsqrt(var + EPS) * g + b


def _gelu(x):
    # tanh-approximate GELU (BERT activation)
    c = 0.7978845608028654  # sqrt(2/pi)
    return 0.5 * x * (1.0 + jnp.tanh(c * (x + 0.044715 * x * x * x)))


# ------------------------------ fused kernel --------------------------------
def bert_fused_kernel(emb_ref, eln_ref, wattn_ref, w1_ref, w2_ref,
                      c1_ref, vec_ref, out_ref):
    """Embedding LayerNorm + all encoder layers, fully resident in VMEM."""
    scale = 1.0 / (HEAD_DIM ** 0.5)

    # Block-diagonal head masks, hoisted out of the layer loop (built once).
    col = jax.lax.broadcasted_iota(jnp.int32, (SEQ, HIDDEN), 1)
    head_masks = [
        jnp.logical_and(col >= h * HEAD_DIM,
                        col < (h + 1) * HEAD_DIM).astype(jnp.float32)
        for h in range(HEADS)
    ]

    # ---- embeddings (already summed in the wrapper) -> LayerNorm ----
    x = _layernorm(emb_ref[...], eln_ref[0:1, :], eln_ref[1:2, :])
    out_ref[0, :, :] = x

    # ---- encoder layers (static unrolled loop over stacked weights) ----
    for l in range(LAYERS):
        wq = wattn_ref[l, 0]
        wk = wattn_ref[l, 1]
        wv = wattn_ref[l, 2]
        wo = wattn_ref[l, 3]
        bq = vec_ref[l, _BQ:_BQ + 1, :]
        bk = vec_ref[l, _BK:_BK + 1, :]
        bv = vec_ref[l, _BV:_BV + 1, :]
        bo = vec_ref[l, _BO:_BO + 1, :]
        g1 = vec_ref[l, _G1:_G1 + 1, :]
        b1 = vec_ref[l, _B1:_B1 + 1, :]
        c2 = vec_ref[l, _C2:_C2 + 1, :]
        g2 = vec_ref[l, _G2:_G2 + 1, :]
        b2 = vec_ref[l, _B2:_B2 + 1, :]
        w1 = w1_ref[l]
        c1 = c1_ref[l]          # (1, INTER)
        w2 = w2_ref[l]

        q = jnp.dot(x, wq, preferred_element_type=jnp.float32) + bq
        k = jnp.dot(x, wk, preferred_element_type=jnp.float32) + bk
        v = jnp.dot(x, wv, preferred_element_type=jnp.float32) + bv

        # Multi-head attention without lane slicing: mask K/V per head
        # (block-diagonal structure), contract full HIDDEN width.
        ctx = jnp.zeros((SEQ, HIDDEN), jnp.float32)
        for h in range(HEADS):
            kh = k * head_masks[h]
            vh = v * head_masks[h]
            sc = jax.lax.dot_general(
                q, kh, (((1,), (1,)), ((), ())),
                preferred_element_type=jnp.float32) * scale
            sc = sc - jnp.max(sc, axis=-1, keepdims=True)
            p = jnp.exp(sc)
            denom = jnp.sum(p, axis=-1, keepdims=True)
            p = p * pl.reciprocal(denom, approx=True)   # EUP, not VPU divide
            ctx = ctx + jnp.dot(p, vh, preferred_element_type=jnp.float32)

        attn = jnp.dot(ctx, wo, preferred_element_type=jnp.float32) + bo
        h1 = _layernorm(x + attn, g1, b1)

        ff = _gelu(jnp.dot(h1, w1, preferred_element_type=jnp.float32) + c1)
        ff = jnp.dot(ff, w2, preferred_element_type=jnp.float32) + c2
        x = _layernorm(h1 + ff, g2, b2)

        out_ref[l + 1, :, :] = x


# ------------------------------ pallas wrapper -------------------------------
def _full_spec(shape):
    # whole-array block (no grid): index_map takes no grid args
    return pl.BlockSpec(shape, lambda: (0,) * len(shape))


@jax.jit
def bert_text_embed(token_ids, params):
    """token_ids: int32[SEQ] (the 'indexed_tokens' of a single prompt).

    Returns a tuple of hidden states, each float32[1, SEQ, HIDDEN]:
    (embedding_output, layer_1_output, ..., layer_N_output).
    """
    # glue: embedding gathers (index lookups) stay in plain JAX; sum them here
    # so the kernel receives a single (SEQ, HIDDEN) embedding tensor.
    word_rows = jnp.take(params["word_emb"], token_ids, axis=0)        # (S, H)
    pos_rows = params["pos_emb"][:SEQ, :]                              # (S, H)
    seg_rows = jnp.broadcast_to(params["type_emb"][1], (SEQ, HIDDEN))  # segments_ids = [1]*len
    emb = word_rows + pos_rows + seg_rows

    args = (emb, params["emb_ln"], params["w_attn"],
            params["w1"], params["w2"], params["c1"], params["vec_h"])

    stacked = pl.pallas_call(
        bert_fused_kernel,
        out_shape=jax.ShapeDtypeStruct((LAYERS + 1, SEQ, HIDDEN), jnp.float32),
        in_specs=[_full_spec(a.shape) for a in args],
        out_specs=_full_spec((LAYERS + 1, SEQ, HIDDEN)),
    )(*args)

    return tuple(stacked[i][None, :, :] for i in range(LAYERS + 1))


# ------------------------------ parameter init -------------------------------
def init_params(key):
    std = 0.02
    keys = jax.random.split(key, 8)
    ki = iter(keys)

    def rnd(shape):
        return jax.random.normal(next(ki), shape, jnp.float32) * std

    # emb LN: row 0 = gamma (ones), row 1 = beta (zeros)
    emb_ln = jnp.concatenate(
        [jnp.ones((1, HIDDEN), jnp.float32), jnp.zeros((1, HIDDEN), jnp.float32)],
        axis=0)

    # packed per-layer H-wide vectors: biases zero, LN gammas one.
    vec_h = jnp.zeros((LAYERS, 9, HIDDEN), jnp.float32)
    vec_h = vec_h.at[:, _G1, :].set(1.0).at[:, _G2, :].set(1.0)

    return {
        "word_emb": rnd((VOCAB, HIDDEN)),
        "pos_emb": rnd((MAX_POS, HIDDEN)),
        "type_emb": rnd((TYPE_VOCAB, HIDDEN)),
        "emb_ln": emb_ln,
        # per-layer weights stacked along a leading layer axis;
        # attention projections further stacked: [wq, wk, wv, wo]
        "w_attn": rnd((LAYERS, 4, HIDDEN, HIDDEN)),
        "w1": rnd((LAYERS, HIDDEN, INTER)),
        "c1": jnp.zeros((LAYERS, 1, INTER), jnp.float32),
        "w2": rnd((LAYERS, INTER, HIDDEN)),
        "vec_h": vec_h,
    }


# ----------------------------------- main ------------------------------------
if __name__ == "__main__":
    key = jax.random.PRNGKey(0)
    pkey, ikey = jax.random.split(key)
    params = init_params(pkey)

    # deterministic "indexed_tokens" for one prompt of length SEQ
    token_ids = jax.random.randint(ikey, (SEQ,), 0, VOCAB, dtype=jnp.int32)

    hidden_states = bert_text_embed(token_ids, params)
    for hs in hidden_states:
        jax.block_until_ready(hs)

    assert len(hidden_states) == LAYERS + 1
    assert all(hs.shape == (1, SEQ, HIDDEN) for hs in hidden_states)
    assert all(bool(jnp.all(jnp.isfinite(hs))) for hs in hidden_states)
    print("KERNEL_OK")
</pallas_src>

<mosaic_0001>
module attributes {stable_mosaic.version = 11 : i64} {
  func.func @bert_fused_kernel(%arg0: memref<8x32xf32, #tpu.memory_space<vmem>>, %arg1: memref<2x32xf32, #tpu.memory_space<vmem>>, %arg2: memref<2x4x32x32xf32, #tpu.memory_space<vmem>>, %arg3: memref<2x32x64xf32, #tpu.memory_space<vmem>>, %arg4: memref<2x64x32xf32, #tpu.memory_space<vmem>>, %arg5: memref<2x1x64xf32, #tpu.memory_space<vmem>>, %arg6: memref<2x9x32xf32, #tpu.memory_space<vmem>>, %arg7: memref<3x8x32xf32, #tpu.memory_space<vmem>>) attributes {dimension_semantics = [], scalar_prefetch = 0 : i64, scratch_operands = 0 : i64, tpu.core_type = #tpu.core_type<tc>} {
    %0 = tpu.iota {dimensions = array<i32: 1>} : vector<8x32xi32>
    %c0_i32 = arith.constant 0 : i32
    %1 = vector.broadcast %c0_i32 : i32 to vector<8x32xi32>
    %2 = arith.cmpi sge, %0, %1 : vector<8x32xi32>
    %c16_i32 = arith.constant 16 : i32
    %3 = vector.broadcast %c16_i32 : i32 to vector<8x32xi32>
    %4 = arith.cmpi slt, %0, %3 : vector<8x32xi32>
    %5 = arith.andi %2, %4 : vector<8x32xi1>
    %6 = arith.extui %5 : vector<8x32xi1> to vector<8x32xi32>
    %7 = arith.sitofp %6 : vector<8x32xi32> to vector<8x32xf32>
    %c16_i32_0 = arith.constant 16 : i32
    %8 = vector.broadcast %c16_i32_0 : i32 to vector<8x32xi32>
    %9 = arith.cmpi sge, %0, %8 : vector<8x32xi32>
    %c32_i32 = arith.constant 32 : i32
    %10 = vector.broadcast %c32_i32 : i32 to vector<8x32xi32>
    %11 = arith.cmpi slt, %0, %10 : vector<8x32xi32>
    %12 = arith.andi %9, %11 : vector<8x32xi1>
    %13 = arith.extui %12 : vector<8x32xi1> to vector<8x32xi32>
    %14 = arith.sitofp %13 : vector<8x32xi32> to vector<8x32xf32>
    %c0 = arith.constant 0 : index
    %c0_1 = arith.constant 0 : index
    %15 = vector.load %arg0[%c0, %c0_1] : memref<8x32xf32, #tpu.memory_space<vmem>>, vector<8x32xf32>
    %c0_2 = arith.constant 0 : index
    %c0_3 = arith.constant 0 : index
    %16 = vector.load %arg1[%c0_2, %c0_3] : memref<2x32xf32, #tpu.memory_space<vmem>>, vector<1x32xf32>
    %c1 = arith.constant 1 : index
    %c0_4 = arith.constant 0 : index
    %17 = vector.load %arg1[%c1, %c0_4] : memref<2x32xf32, #tpu.memory_space<vmem>>, vector<1x32xf32>
    %cst = arith.constant dense<0.000000e+00> : vector<8xf32>
    %18 = vector.multi_reduction <add>, %15, %cst [1] : vector<8x32xf32> to vector<8xf32>
    %19 = vector.shape_cast %18 : vector<8xf32> to vector<8x1xf32>
    %cst_5 = arith.constant 3.200000e+01 : f32
    %20 = vector.broadcast %cst_5 : f32 to vector<8x1xf32>
    %21 = arith.divf %19, %20 : vector<8x1xf32>
    %22 = vector.broadcast %21 : vector<8x1xf32> to vector<8x32xf32>
    %23 = arith.subf %15, %22 : vector<8x32xf32>
    %24 = arith.mulf %23, %23 : vector<8x32xf32>
    %cst_6 = arith.constant dense<0.000000e+00> : vector<8xf32>
    %25 = vector.multi_reduction <add>, %24, %cst_6 [1] : vector<8x32xf32> to vector<8xf32>
    %26 = vector.shape_cast %25 : vector<8xf32> to vector<8x1xf32>
    %cst_7 = arith.constant 3.200000e+01 : f32
    %27 = vector.broadcast %cst_7 : f32 to vector<8x1xf32>
    %28 = arith.divf %26, %27 : vector<8x1xf32>
    %cst_8 = arith.constant 9.99999996E-13 : f32
    %29 = vector.broadcast %cst_8 : f32 to vector<8x1xf32>
    %30 = arith.addf %28, %29 : vector<8x1xf32>
    %31 = math.rsqrt %30 : vector<8x1xf32>
    %32 = vector.broadcast %31 : vector<8x1xf32> to vector<8x32xf32>
    %33 = arith.mulf %23, %32 : vector<8x32xf32>
    %34 = vector.broadcast %16 : vector<1x32xf32> to vector<8x32xf32>
    %35 = arith.mulf %33, %34 : vector<8x32xf32>
    %36 = vector.broadcast %17 : vector<1x32xf32> to vector<8x32xf32>
    %37 = arith.addf %35, %36 : vector<8x32xf32>
    %c0_9 = arith.constant 0 : index
    %c0_10 = arith.constant 0 : index
    %c0_11 = arith.constant 0 : index
    %38 = vector.load %arg7[%c0_9, %c0_10, %c0_11] : memref<3x8x32xf32, #tpu.memory_space<vmem>>, vector<1x8x32xf32>
    %39 = vector.shape_cast %38 : vector<1x8x32xf32> to vector<8x32xf32>
    %40 = vector.shape_cast %37 : vector<8x32xf32> to vector<1x8x32xf32>
    tpu.vector_store %arg7[%c0_9, %c0_10, %c0_11], %40 {strides = array<i32>} : memref<3x8x32xf32, #tpu.memory_space<vmem>>, vector<1x8x32xf32>,
    %c0_12 = arith.constant 0 : index
    %c0_13 = arith.constant 0 : index
    %c0_14 = arith.constant 0 : index
    %c0_15 = arith.constant 0 : index
    %41 = vector.load %arg2[%c0_12, %c0_13, %c0_14, %c0_15] : memref<2x4x32x32xf32, #tpu.memory_space<vmem>>, vector<1x1x32x32xf32>
    %42 = vector.shape_cast %41 : vector<1x1x32x32xf32> to vector<32x32xf32>
    %c0_16 = arith.constant 0 : index
    %c1_17 = arith.constant 1 : index
    %c0_18 = arith.constant 0 : index
    %c0_19 = arith.constant 0 : index
    %43 = vector.load %arg2[%c0_16, %c1_17, %c0_18, %c0_19] : memref<2x4x32x32xf32, #tpu.memory_space<vmem>>, vector<1x1x32x32xf32>
    %44 = vector.shape_cast %43 : vector<1x1x32x32xf32> to vector<32x32xf32>
    %c0_20 = arith.constant 0 : index
    %c2 = arith.constant 2 : index
    %c0_21 = arith.constant 0 : index
    %c0_22 = arith.constant 0 : index
    %45 = vector.load %arg2[%c0_20, %c2, %c0_21, %c0_22] : memref<2x4x32x32xf32, #tpu.memory_space<vmem>>, vector<1x1x32x32xf32>
    %46 = vector.shape_cast %45 : vector<1x1x32x32xf32> to vector<32x32xf32>
    %c0_23 = arith.constant 0 : index
    %c3 = arith.constant 3 : index
    %c0_24 = arith.constant 0 : index
    %c0_25 = arith.constant 0 : index
    %47 = vector.load %arg2[%c0_23, %c3, %c0_24, %c0_25] : memref<2x4x32x32xf32, #tpu.memory_space<vmem>>, vector<1x1x32x32xf32>
    %48 = vector.shape_cast %47 : vector<1x1x32x32xf32> to vector<32x32xf32>
    %c0_26 = arith.constant 0 : index
    %c0_27 = arith.constant 0 : index
    %c0_28 = arith.constant 0 : index
    %49 = vector.load %arg6[%c0_26, %c0_27, %c0_28] : memref<2x9x32xf32, #tpu.memory_space<vmem>>, vector<1x1x32xf32>
    %50 = vector.shape_cast %49 : vector<1x1x32xf32> to vector<1x32xf32>
    %c0_29 = arith.constant 0 : index
    %c1_30 = arith.constant 1 : index
    %c0_31 = arith.constant 0 : index
    %51 = vector.load %arg6[%c0_29, %c1_30, %c0_31] : memref<2x9x32xf32, #tpu.memory_space<vmem>>, vector<1x1x32xf32>
    %52 = vector.shape_cast %51 : vector<1x1x32xf32> to vector<1x32xf32>
    %c0_32 = arith.constant 0 : index
    %c2_33 = arith.constant 2 : index
    %c0_34 = arith.constant 0 : index
    %53 = vector.load %arg6[%c0_32, %c2_33, %c0_34] : memref<2x9x32xf32, #tpu.memory_space<vmem>>, vector<1x1x32xf32>
    %54 = vector.shape_cast %53 : vector<1x1x32xf32> to vector<1x32xf32>
    %c0_35 = arith.constant 0 : index
    %c3_36 = arith.constant 3 : index
    %c0_37 = arith.constant 0 : index
    %55 = vector.load %arg6[%c0_35, %c3_36, %c0_37] : memref<2x9x32xf32, #tpu.memory_space<vmem>>, vector<1x1x32xf32>
    %56 = vector.shape_cast %55 : vector<1x1x32xf32> to vector<1x32xf32>
    %c0_38 = arith.constant 0 : index
    %c4 = arith.constant 4 : index
    %c0_39 = arith.constant 0 : index
    %57 = vector.load %arg6[%c0_38, %c4, %c0_39] : memref<2x9x32xf32, #tpu.memory_space<vmem>>, vector<1x1x32xf32>
    %58 = vector.shape_cast %57 : vector<1x1x32xf32> to vector<1x32xf32>
    %c0_40 = arith.constant 0 : index
    %c5 = arith.constant 5 : index
    %c0_41 = arith.constant 0 : index
    %59 = vector.load %arg6[%c0_40, %c5, %c0_41] : memref<2x9x32xf32, #tpu.memory_space<vmem>>, vector<1x1x32xf32>
    %60 = vector.shape_cast %59 : vector<1x1x32xf32> to vector<1x32xf32>
    %c0_42 = arith.constant 0 : index
    %c6 = arith.constant 6 : index
    %c0_43 = arith.constant 0 : index
    %61 = vector.load %arg6[%c0_42, %c6, %c0_43] : memref<2x9x32xf32, #tpu.memory_space<vmem>>, vector<1x1x32xf32>
    %62 = vector.shape_cast %61 : vector<1x1x32xf32> to vector<1x32xf32>
    %c0_44 = arith.constant 0 : index
    %c7 = arith.constant 7 : index
    %c0_45 = arith.constant 0 : index
    %63 = vector.load %arg6[%c0_44, %c7, %c0_45] : memref<2x9x32xf32, #tpu.memory_space<vmem>>, vector<1x1x32xf32>
    %64 = vector.shape_cast %63 : vector<1x1x32xf32> to vector<1x32xf32>
    %c0_46 = arith.constant 0 : index
    %c8 = arith.constant 8 : index
    %c0_47 = arith.constant 0 : index
    %65 = vector.load %arg6[%c0_46, %c8, %c0_47] : memref<2x9x32xf32, #tpu.memory_space<vmem>>, vector<1x1x32xf32>
    %66 = vector.shape_cast %65 : vector<1x1x32xf32> to vector<1x32xf32>
    %c0_48 = arith.constant 0 : index
    %c0_49 = arith.constant 0 : index
    %c0_50 = arith.constant 0 : index
    %67 = vector.load %arg3[%c0_48, %c0_49, %c0_50] : memref<2x32x64xf32, #tpu.memory_space<vmem>>, vector<1x32x64xf32>
    %68 = vector.shape_cast %67 : vector<1x32x64xf32> to vector<32x64xf32>
    %c0_51 = arith.constant 0 : index
    %c0_52 = arith.constant 0 : index
    %c0_53 = arith.constant 0 : index
    %69 = vector.load %arg5[%c0_51, %c0_52, %c0_53] : memref<2x1x64xf32, #tpu.memory_space<vmem>>, vector<1x1x64xf32>
    %70 = vector.shape_cast %69 : vector<1x1x64xf32> to vector<1x64xf32>
    %c0_54 = arith.constant 0 : index
    %c0_55 = arith.constant 0 : index
    %c0_56 = arith.constant 0 : index
    %71 = vector.load %arg4[%c0_54, %c0_55, %c0_56] : memref<2x64x32xf32, #tpu.memory_space<vmem>>, vector<1x64x32xf32>
    %72 = vector.shape_cast %71 : vector<1x64x32xf32> to vector<64x32xf32>
    %cst_57 = arith.constant dense<0.000000e+00> : vector<8x32xf32>
    %73 = tpu.matmul %37, %42, %cst_57 {dimension_numbers = #tpu.dot_dimension_numbers<[1], [0], [0], [1], [0, 0, 1, 1], [], []>} : vector<8x32xf32>, vector<32x32xf32>, vector<8x32xf32> -> vector<8x32xf32>
    %74 = vector.broadcast %50 : vector<1x32xf32> to vector<8x32xf32>
    %75 = arith.addf %73, %74 : vector<8x32xf32>
    %cst_58 = arith.constant dense<0.000000e+00> : vector<8x32xf32>
    %76 = tpu.matmul %37, %44, %cst_58 {dimension_numbers = #tpu.dot_dimension_numbers<[1], [0], [0], [1], [0, 0, 1, 1], [], []>} : vector<8x32xf32>, vector<32x32xf32>, vector<8x32xf32> -> vector<8x32xf32>
    %77 = vector.broadcast %52 : vector<1x32xf32> to vector<8x32xf32>
    %78 = arith.addf %76, %77 : vector<8x32xf32>
    %cst_59 = arith.constant dense<0.000000e+00> : vector<8x32xf32>
    %79 = tpu.matmul %37, %46, %cst_59 {dimension_numbers = #tpu.dot_dimension_numbers<[1], [0], [0], [1], [0, 0, 1, 1], [], []>} : vector<8x32xf32>, vector<32x32xf32>, vector<8x32xf32> -> vector<8x32xf32>
    %80 = vector.broadcast %54 : vector<1x32xf32> to vector<8x32xf32>
    %81 = arith.addf %79, %80 : vector<8x32xf32>
    %cst_60 = arith.constant 0.000000e+00 : f32
    %82 = vector.broadcast %cst_60 : f32 to vector<8x32xf32>
    %83 = arith.mulf %78, %7 : vector<8x32xf32>
    %84 = arith.mulf %81, %7 : vector<8x32xf32>
    %cst_61 = arith.constant dense<0.000000e+00> : vector<8x8xf32>
    %85 = tpu.matmul %75, %83, %cst_61 {dimension_numbers = #tpu.dot_dimension_numbers<[1], [1], [0], [0], [0, 0, 1, 0], [], []>} : vector<8x32xf32>, vector<8x32xf32>, vector<8x8xf32> -> vector<8x8xf32>
    %cst_62 = arith.constant 2.500000e-01 : f32
    %86 = vector.broadcast %cst_62 : f32 to vector<8x8xf32>
    %87 = arith.mulf %85, %86 : vector<8x8xf32>
    %cst_63 = arith.constant dense<0xFF800000> : vector<8xf32>
    %88 = vector.multi_reduction <maximumf>, %87, %cst_63 [1] : vector<8x8xf32> to vector<8xf32>
    %89 = vector.shape_cast %88 : vector<8xf32> to vector<8x1xf32>
    %90 = vector.broadcast %89 : vector<8x1xf32> to vector<8x8xf32>
    %91 = arith.subf %87, %90 : vector<8x8xf32>
    %92 = math.exp %91 : vector<8x8xf32>
    %cst_64 = arith.constant dense<0.000000e+00> : vector<8xf32>
    %93 = vector.multi_reduction <add>, %92, %cst_64 [1] : vector<8x8xf32> to vector<8xf32>
    %94 = vector.shape_cast %93 : vector<8xf32> to vector<8x1xf32>
    %95 = tpu.reciprocal %94 {approx = true} : vector<8x1xf32> -> vector<8x1xf32>
    %96 = vector.broadcast %95 : vector<8x1xf32> to vector<8x8xf32>
    %97 = arith.mulf %92, %96 : vector<8x8xf32>
    %cst_65 = arith.constant dense<0.000000e+00> : vector<8x32xf32>
    %98 = tpu.matmul %97, %84, %cst_65 {dimension_numbers = #tpu.dot_dimension_numbers<[1], [0], [0], [1], [0, 0, 1, 1], [], []>} : vector<8x8xf32>, vector<8x32xf32>, vector<8x32xf32> -> vector<8x32xf32>
    %99 = arith.addf %82, %98 : vector<8x32xf32>
    %100 = arith.mulf %78, %14 : vector<8x32xf32>
    %101 = arith.mulf %81, %14 : vector<8x32xf32>
    %cst_66 = arith.constant dense<0.000000e+00> : vector<8x8xf32>
    %102 = tpu.matmul %75, %100, %cst_66 {dimension_numbers = #tpu.dot_dimension_numbers<[1], [1], [0], [0], [0, 0, 1, 0], [], []>} : vector<8x32xf32>, vector<8x32xf32>, vector<8x8xf32> -> vector<8x8xf32>
    %cst_67 = arith.constant 2.500000e-01 : f32
    %103 = vector.broadcast %cst_67 : f32 to vector<8x8xf32>
    %104 = arith.mulf %102, %103 : vector<8x8xf32>
    %cst_68 = arith.constant dense<0xFF800000> : vector<8xf32>
    %105 = vector.multi_reduction <maximumf>, %104, %cst_68 [1] : vector<8x8xf32> to vector<8xf32>
    %106 = vector.shape_cast %105 : vector<8xf32> to vector<8x1xf32>
    %107 = vector.broadcast %106 : vector<8x1xf32> to vector<8x8xf32>
    %108 = arith.subf %104, %107 : vector<8x8xf32>
    %109 = math.exp %108 : vector<8x8xf32>
    %cst_69 = arith.constant dense<0.000000e+00> : vector<8xf32>
    %110 = vector.multi_reduction <add>, %109, %cst_69 [1] : vector<8x8xf32> to vector<8xf32>
    %111 = vector.shape_cast %110 : vector<8xf32> to vector<8x1xf32>
    %112 = tpu.reciprocal %111 {approx = true} : vector<8x1xf32> -> vector<8x1xf32>
    %113 = vector.broadcast %112 : vector<8x1xf32> to vector<8x8xf32>
    %114 = arith.mulf %109, %113 : vector<8x8xf32>
    %cst_70 = arith.constant dense<0.000000e+00> : vector<8x32xf32>
    %115 = tpu.matmul %114, %101, %cst_70 {dimension_numbers = #tpu.dot_dimension_numbers<[1], [0], [0], [1], [0, 0, 1, 1], [], []>} : vector<8x8xf32>, vector<8x32xf32>, vector<8x32xf32> -> vector<8x32xf32>
    %116 = arith.addf %99, %115 : vector<8x32xf32>
    %cst_71 = arith.constant dense<0.000000e+00> : vector<8x32xf32>
    %117 = tpu.matmul %116, %48, %cst_71 {dimension_numbers = #tpu.dot_dimension_numbers<[1], [0], [0], [1], [0, 0, 1, 1], [], []>} : vector<8x32xf32>, vector<32x32xf32>, vector<8x32xf32> -> vector<8x32xf32>
    %118 = vector.broadcast %56 : vector<1x32xf32> to vector<8x32xf32>
    %119 = arith.addf %117, %118 : vector<8x32xf32>
    %120 = arith.addf %37, %119 : vector<8x32xf32>
    %cst_72 = arith.constant dense<0.000000e+00> : vector<8xf32>
    %121 = vector.multi_reduction <add>, %120, %cst_72 [1] : vector<8x32xf32> to vector<8xf32>
    %122 = vector.shape_cast %121 : vector<8xf32> to vector<8x1xf32>
    %cst_73 = arith.constant 3.200000e+01 : f32
    %123 = vector.broadcast %cst_73 : f32 to vector<8x1xf32>
    %124 = arith.divf %122, %123 : vector<8x1xf32>
    %125 = vector.broadcast %124 : vector<8x1xf32> to vector<8x32xf32>
    %126 = arith.subf %120, %125 : vector<8x32xf32>
    %127 = arith.mulf %126, %126 : vector<8x32xf32>
    %cst_74 = arith.constant dense<0.000000e+00> : vector<8xf32>
    %128 = vector.multi_reduction <add>, %127, %cst_74 [1] : vector<8x32xf32> to vector<8xf32>
    %129 = vector.shape_cast %128 : vector<8xf32> to vector<8x1xf32>
    %cst_75 = arith.constant 3.200000e+01 : f32
    %130 = vector.broadcast %cst_75 : f32 to vector<8x1xf32>
    %131 = arith.divf %129, %130 : vector<8x1xf32>
    %cst_76 = arith.constant 9.99999996E-13 : f32
    %132 = vector.broadcast %cst_76 : f32 to vector<8x1xf32>
    %133 = arith.addf %131, %132 : vector<8x1xf32>
    %134 = math.rsqrt %133 : vector<8x1xf32>
    %135 = vector.broadcast %134 : vector<8x1xf32> to vector<8x32xf32>
    %136 = arith.mulf %126, %135 : vector<8x32xf32>
    %137 = vector.broadcast %58 : vector<1x32xf32> to vector<8x32xf32>
    %138 = arith.mulf %136, %137 : vector<8x32xf32>
    %139 = vector.broadcast %60 : vector<1x32xf32> to vector<8x32xf32>
    %140 = arith.addf %138, %139 : vector<8x32xf32>
    %cst_77 = arith.constant dense<0.000000e+00> : vector<8x64xf32>
    %141 = tpu.matmul %140, %68, %cst_77 {dimension_numbers = #tpu.dot_dimension_numbers<[1], [0], [0], [1], [0, 0, 1, 1], [], []>} : vector<8x32xf32>, vector<32x64xf32>, vector<8x64xf32> -> vector<8x64xf32>
    %142 = vector.broadcast %70 : vector<1x64xf32> to vector<8x64xf32>
    %143 = arith.addf %141, %142 : vector<8x64xf32>
    %cst_78 = arith.constant 5.000000e-01 : f32
    %144 = vector.broadcast %cst_78 : f32 to vector<8x64xf32>
    %145 = arith.mulf %144, %143 : vector<8x64xf32>
    %cst_79 = arith.constant 4.471500e-02 : f32
    %146 = vector.broadcast %cst_79 : f32 to vector<8x64xf32>
    %147 = arith.mulf %146, %143 : vector<8x64xf32>
    %148 = arith.mulf %147, %143 : vector<8x64xf32>
    %149 = arith.mulf %148, %143 : vector<8x64xf32>
    %150 = arith.addf %143, %149 : vector<8x64xf32>
    %cst_80 = arith.constant 0.797884583 : f32
    %151 = vector.broadcast %cst_80 : f32 to vector<8x64xf32>
    %152 = arith.mulf %151, %150 : vector<8x64xf32>
    %153 = math.tanh %152 : vector<8x64xf32>
    %cst_81 = arith.constant 1.000000e+00 : f32
    %154 = vector.broadcast %cst_81 : f32 to vector<8x64xf32>
    %155 = arith.addf %154, %153 : vector<8x64xf32>
    %156 = arith.mulf %145, %155 : vector<8x64xf32>
    %cst_82 = arith.constant dense<0.000000e+00> : vector<8x32xf32>
    %157 = tpu.matmul %156, %72, %cst_82 {dimension_numbers = #tpu.dot_dimension_numbers<[1], [0], [0], [1], [0, 0, 1, 1], [], []>} : vector<8x64xf32>, vector<64x32xf32>, vector<8x32xf32> -> vector<8x32xf32>
    %158 = vector.broadcast %62 : vector<1x32xf32> to vector<8x32xf32>
    %159 = arith.addf %157, %158 : vector<8x32xf32>
    %160 = arith.addf %140, %159 : vector<8x32xf32>
    %cst_83 = arith.constant dense<0.000000e+00> : vector<8xf32>
    %161 = vector.multi_reduction <add>, %160, %cst_83 [1] : vector<8x32xf32> to vector<8xf32>
    %162 = vector.shape_cast %161 : vector<8xf32> to vector<8x1xf32>
    %cst_84 = arith.constant 3.200000e+01 : f32
    %163 = vector.broadcast %cst_84 : f32 to vector<8x1xf32>
    %164 = arith.divf %162, %163 : vector<8x1xf32>
    %165 = vector.broadcast %164 : vector<8x1xf32> to vector<8x32xf32>
    %166 = arith.subf %160, %165 : vector<8x32xf32>
    %167 = arith.mulf %166, %166 : vector<8x32xf32>
    %cst_85 = arith.constant dense<0.000000e+00> : vector<8xf32>
    %168 = vector.multi_reduction <add>, %167, %cst_85 [1] : vector<8x32xf32> to vector<8xf32>
    %169 = vector.shape_cast %168 : vector<8xf32> to vector<8x1xf32>
    %cst_86 = arith.constant 3.200000e+01 : f32
    %170 = vector.broadcast %cst_86 : f32 to vector<8x1xf32>
    %171 = arith.divf %169, %170 : vector<8x1xf32>
    %cst_87 = arith.constant 9.99999996E-13 : f32
    %172 = vector.broadcast %cst_87 : f32 to vector<8x1xf32>
    %173 = arith.addf %171, %172 : vector<8x1xf32>
    %174 = math.rsqrt %173 : vector<8x1xf32>
    %175 = vector.broadcast %174 : vector<8x1xf32> to vector<8x32xf32>
    %176 = arith.mulf %166, %175 : vector<8x32xf32>
    %177 = vector.broadcast %64 : vector<1x32xf32> to vector<8x32xf32>
    %178 = arith.mulf %176, %177 : vector<8x32xf32>
    %179 = vector.broadcast %66 : vector<1x32xf32> to vector<8x32xf32>
    %180 = arith.addf %178, %179 : vector<8x32xf32>
    %c1_88 = arith.constant 1 : index
    %c0_89 = arith.constant 0 : index
    %c0_90 = arith.constant 0 : index
    %181 = vector.load %arg7[%c1_88, %c0_89, %c0_90] : memref<3x8x32xf32, #tpu.memory_space<vmem>>, vector<1x8x32xf32>
    %182 = vector.shape_cast %181 : vector<1x8x32xf32> to vector<8x32xf32>
    %183 = vector.shape_cast %180 : vector<8x32xf32> to vector<1x8x32xf32>
    tpu.vector_store %arg7[%c1_88, %c0_89, %c0_90], %183 {strides = array<i32>} : memref<3x8x32xf32, #tpu.memory_space<vmem>>, vector<1x8x32xf32>,
    %c1_91 = arith.constant 1 : index
    %c0_92 = arith.constant 0 : index
    %c0_93 = arith.constant 0 : index
    %c0_94 = arith.constant 0 : index
    %184 = vector.load %arg2[%c1_91, %c0_92, %c0_93, %c0_94] : memref<2x4x32x32xf32, #tpu.memory_space<vmem>>, vector<1x1x32x32xf32>
    %185 = vector.shape_cast %184 : vector<1x1x32x32xf32> to vector<32x32xf32>
    %c1_95 = arith.constant 1 : index
    %c1_96 = arith.constant 1 : index
    %c0_97 = arith.constant 0 : index
    %c0_98 = arith.constant 0 : index
    %186 = vector.load %arg2[%c1_95, %c1_96, %c0_97, %c0_98] : memref<2x4x32x32xf32, #tpu.memory_space<vmem>>, vector<1x1x32x32xf32>
    %187 = vector.shape_cast %186 : vector<1x1x32x32xf32> to vector<32x32xf32>
    %c1_99 = arith.constant 1 : index
    %c2_100 = arith.constant 2 : index
    %c0_101 = arith.constant 0 : index
    %c0_102 = arith.constant 0 : index
    %188 = vector.load %arg2[%c1_99, %c2_100, %c0_101, %c0_102] : memref<2x4x32x32xf32, #tpu.memory_space<vmem>>, vector<1x1x32x32xf32>
    %189 = vector.shape_cast %188 : vector<1x1x32x32xf32> to vector<32x32xf32>
    %c1_103 = arith.constant 1 : index
    %c3_104 = arith.constant 3 : index
    %c0_105 = arith.constant 0 : index
    %c0_106 = arith.constant 0 : index
    %190 = vector.load %arg2[%c1_103, %c3_104, %c0_105, %c0_106] : memref<2x4x32x32xf32, #tpu.memory_space<vmem>>, vector<1x1x32x32xf32>
    %191 = vector.shape_cast %190 : vector<1x1x32x32xf32> to vector<32x32xf32>
    %c1_107 = arith.constant 1 : index
    %c0_108 = arith.constant 0 : index
    %c0_109 = arith.constant 0 : index
    %192 = vector.load %arg6[%c1_107, %c0_108, %c0_109] : memref<2x9x32xf32, #tpu.memory_space<vmem>>, vector<1x1x32xf32>
    %193 = vector.shape_cast %192 : vector<1x1x32xf32> to vector<1x32xf32>
    %c1_110 = arith.constant 1 : index
    %c1_111 = arith.constant 1 : index
    %c0_112 = arith.constant 0 : index
    %194 = vector.load %arg6[%c1_110, %c1_111, %c0_112] : memref<2x9x32xf32, #tpu.memory_space<vmem>>, vector<1x1x32xf32>
    %195 = vector.shape_cast %194 : vector<1x1x32xf32> to vector<1x32xf32>
    %c1_113 = arith.constant 1 : index
    %c2_114 = arith.constant 2 : index
    %c0_115 = arith.constant 0 : index
    %196 = vector.load %arg6[%c1_113, %c2_114, %c0_115] : memref<2x9x32xf32, #tpu.memory_space<vmem>>, vector<1x1x32xf32>
    %197 = vector.shape_cast %196 : vector<1x1x32xf32> to vector<1x32xf32>
    %c1_116 = arith.constant 1 : index
    %c3_117 = arith.constant 3 : index
    %c0_118 = arith.constant 0 : index
    %198 = vector.load %arg6[%c1_116, %c3_117, %c0_118] : memref<2x9x32xf32, #tpu.memory_space<vmem>>, vector<1x1x32xf32>
    %199 = vector.shape_cast %198 : vector<1x1x32xf32> to vector<1x32xf32>
    %c1_119 = arith.constant 1 : index
    %c4_120 = arith.constant 4 : index
    %c0_121 = arith.constant 0 : index
    %200 = vector.load %arg6[%c1_119, %c4_120, %c0_121] : memref<2x9x32xf32, #tpu.memory_space<vmem>>, vector<1x1x32xf32>
    %201 = vector.shape_cast %200 : vector<1x1x32xf32> to vector<1x32xf32>
    %c1_122 = arith.constant 1 : index
    %c5_123 = arith.constant 5 : index
    %c0_124 = arith.constant 0 : index
    %202 = vector.load %arg6[%c1_122, %c5_123, %c0_124] : memref<2x9x32xf32, #tpu.memory_space<vmem>>, vector<1x1x32xf32>
    %203 = vector.shape_cast %202 : vector<1x1x32xf32> to vector<1x32xf32>
    %c1_125 = arith.constant 1 : index
    %c6_126 = arith.constant 6 : index
    %c0_127 = arith.constant 0 : index
    %204 = vector.load %arg6[%c1_125, %c6_126, %c0_127] : memref<2x9x32xf32, #tpu.memory_space<vmem>>, vector<1x1x32xf32>
    %205 = vector.shape_cast %204 : vector<1x1x32xf32> to vector<1x32xf32>
    %c1_128 = arith.constant 1 : index
    %c7_129 = arith.constant 7 : index
    %c0_130 = arith.constant 0 : index
    %206 = vector.load %arg6[%c1_128, %c7_129, %c0_130] : memref<2x9x32xf32, #tpu.memory_space<vmem>>, vector<1x1x32xf32>
    %207 = vector.shape_cast %206 : vector<1x1x32xf32> to vector<1x32xf32>
    %c1_131 = arith.constant 1 : index
    %c8_132 = arith.constant 8 : index
    %c0_133 = arith.constant 0 : index
    %208 = vector.load %arg6[%c1_131, %c8_132, %c0_133] : memref<2x9x32xf32, #tpu.memory_space<vmem>>, vector<1x1x32xf32>
    %209 = vector.shape_cast %208 : vector<1x1x32xf32> to vector<1x32xf32>
    %c1_134 = arith.constant 1 : index
    %c0_135 = arith.constant 0 : index
    %c0_136 = arith.constant 0 : index
    %210 = vector.load %arg3[%c1_134, %c0_135, %c0_136] : memref<2x32x64xf32, #tpu.memory_space<vmem>>, vector<1x32x64xf32>
    %211 = vector.shape_cast %210 : vector<1x32x64xf32> to vector<32x64xf32>
    %c1_137 = arith.constant 1 : index
    %c0_138 = arith.constant 0 : index
    %c0_139 = arith.constant 0 : index
    %212 = vector.load %arg5[%c1_137, %c0_138, %c0_139] : memref<2x1x64xf32, #tpu.memory_space<vmem>>, vector<1x1x64xf32>
    %213 = vector.shape_cast %212 : vector<1x1x64xf32> to vector<1x64xf32>
    %c1_140 = arith.constant 1 : index
    %c0_141 = arith.constant 0 : index
    %c0_142 = arith.constant 0 : index
    %214 = vector.load %arg4[%c1_140, %c0_141, %c0_142] : memref<2x64x32xf32, #tpu.memory_space<vmem>>, vector<1x64x32xf32>
    %215 = vector.shape_cast %214 : vector<1x64x32xf32> to vector<64x32xf32>
    %cst_143 = arith.constant dense<0.000000e+00> : vector<8x32xf32>
    %216 = tpu.matmul %180, %185, %cst_143 {dimension_numbers = #tpu.dot_dimension_numbers<[1], [0], [0], [1], [0, 0, 1, 1], [], []>} : vector<8x32xf32>, vector<32x32xf32>, vector<8x32xf32> -> vector<8x32xf32>
    %217 = vector.broadcast %193 : vector<1x32xf32> to vector<8x32xf32>
    %218 = arith.addf %216, %217 : vector<8x32xf32>
    %cst_144 = arith.constant dense<0.000000e+00> : vector<8x32xf32>
    %219 = tpu.matmul %180, %187, %cst_144 {dimension_numbers = #tpu.dot_dimension_numbers<[1], [0], [0], [1], [0, 0, 1, 1], [], []>} : vector<8x32xf32>, vector<32x32xf32>, vector<8x32xf32> -> vector<8x32xf32>
    %220 = vector.broadcast %195 : vector<1x32xf32> to vector<8x32xf32>
    %221 = arith.addf %219, %220 : vector<8x32xf32>
    %cst_145 = arith.constant dense<0.000000e+00> : vector<8x32xf32>
    %222 = tpu.matmul %180, %189, %cst_145 {dimension_numbers = #tpu.dot_dimension_numbers<[1], [0], [0], [1], [0, 0, 1, 1], [], []>} : vector<8x32xf32>, vector<32x32xf32>, vector<8x32xf32> -> vector<8x32xf32>
    %223 = vector.broadcast %197 : vector<1x32xf32> to vector<8x32xf32>
    %224 = arith.addf %222, %223 : vector<8x32xf32>
    %cst_146 = arith.constant 0.000000e+00 : f32
    %225 = vector.broadcast %cst_146 : f32 to vector<8x32xf32>
    %226 = arith.mulf %221, %7 : vector<8x32xf32>
    %227 = arith.mulf %224, %7 : vector<8x32xf32>
    %cst_147 = arith.constant dense<0.000000e+00> : vector<8x8xf32>
    %228 = tpu.matmul %218, %226, %cst_147 {dimension_numbers = #tpu.dot_dimension_numbers<[1], [1], [0], [0], [0, 0, 1, 0], [], []>} : vector<8x32xf32>, vector<8x32xf32>, vector<8x8xf32> -> vector<8x8xf32>
    %cst_148 = arith.constant 2.500000e-01 : f32
    %229 = vector.broadcast %cst_148 : f32 to vector<8x8xf32>
    %230 = arith.mulf %228, %229 : vector<8x8xf32>
    %cst_149 = arith.constant dense<0xFF800000> : vector<8xf32>
    %231 = vector.multi_reduction <maximumf>, %230, %cst_149 [1] : vector<8x8xf32> to vector<8xf32>
    %232 = vector.shape_cast %231 : vector<8xf32> to vector<8x1xf32>
    %233 = vector.broadcast %232 : vector<8x1xf32> to vector<8x8xf32>
    %234 = arith.subf %230, %233 : vector<8x8xf32>
    %235 = math.exp %234 : vector<8x8xf32>
    %cst_150 = arith.constant dense<0.000000e+00> : vector<8xf32>
    %236 = vector.multi_reduction <add>, %235, %cst_150 [1] : vector<8x8xf32> to vector<8xf32>
    %237 = vector.shape_cast %236 : vector<8xf32> to vector<8x1xf32>
    %238 = tpu.reciprocal %237 {approx = true} : vector<8x1xf32> -> vector<8x1xf32>
    %239 = vector.broadcast %238 : vector<8x1xf32> to vector<8x8xf32>
    %240 = arith.mulf %235, %239 : vector<8x8xf32>
    %cst_151 = arith.constant dense<0.000000e+00> : vector<8x32xf32>
    %241 = tpu.matmul %240, %227, %cst_151 {dimension_numbers = #tpu.dot_dimension_numbers<[1], [0], [0], [1], [0, 0, 1, 1], [], []>} : vector<8x8xf32>, vector<8x32xf32>, vector<8x32xf32> -> vector<8x32xf32>
    %242 = arith.addf %225, %241 : vector<8x32xf32>
    %243 = arith.mulf %221, %14 : vector<8x32xf32>
    %244 = arith.mulf %224, %14 : vector<8x32xf32>
    %cst_152 = arith.constant dense<0.000000e+00> : vector<8x8xf32>
    %245 = tpu.matmul %218, %243, %cst_152 {dimension_numbers = #tpu.dot_dimension_numbers<[1], [1], [0], [0], [0, 0, 1, 0], [], []>} : vector<8x32xf32>, vector<8x32xf32>, vector<8x8xf32> -> vector<8x8xf32>
    %cst_153 = arith.constant 2.500000e-01 : f32
    %246 = vector.broadcast %cst_153 : f32 to vector<8x8xf32>
    %247 = arith.mulf %245, %246 : vector<8x8xf32>
    %cst_154 = arith.constant dense<0xFF800000> : vector<8xf32>
    %248 = vector.multi_reduction <maximumf>, %247, %cst_154 [1] : vector<8x8xf32> to vector<8xf32>
    %249 = vector.shape_cast %248 : vector<8xf32> to vector<8x1xf32>
    %250 = vector.broadcast %249 : vector<8x1xf32> to vector<8x8xf32>
    %251 = arith.subf %247, %250 : vector<8x8xf32>
    %252 = math.exp %251 : vector<8x8xf32>
    %cst_155 = arith.constant dense<0.000000e+00> : vector<8xf32>
    %253 = vector.multi_reduction <add>, %252, %cst_155 [1] : vector<8x8xf32> to vector<8xf32>
    %254 = vector.shape_cast %253 : vector<8xf32> to vector<8x1xf32>
    %255 = tpu.reciprocal %254 {approx = true} : vector<8x1xf32> -> vector<8x1xf32>
    %256 = vector.broadcast %255 : vector<8x1xf32> to vector<8x8xf32>
    %257 = arith.mulf %252, %256 : vector<8x8xf32>
    %cst_156 = arith.constant dense<0.000000e+00> : vector<8x32xf32>
    %258 = tpu.matmul %257, %244, %cst_156 {dimension_numbers = #tpu.dot_dimension_numbers<[1], [0], [0], [1], [0, 0, 1, 1], [], []>} : vector<8x8xf32>, vector<8x32xf32>, vector<8x32xf32> -> vector<8x32xf32>
    %259 = arith.addf %242, %258 : vector<8x32xf32>
    %cst_157 = arith.constant dense<0.000000e+00> : vector<8x32xf32>
    %260 = tpu.matmul %259, %191, %cst_157 {dimension_numbers = #tpu.dot_dimension_numbers<[1], [0], [0], [1], [0, 0, 1, 1], [], []>} : vector<8x32xf32>, vector<32x32xf32>, vector<8x32xf32> -> vector<8x32xf32>
    %261 = vector.broadcast %199 : vector<1x32xf32> to vector<8x32xf32>
    %262 = arith.addf %260, %261 : vector<8x32xf32>
    %263 = arith.addf %180, %262 : vector<8x32xf32>
    %cst_158 = arith.constant dense<0.000000e+00> : vector<8xf32>
    %264 = vector.multi_reduction <add>, %263, %cst_158 [1] : vector<8x32xf32> to vector<8xf32>
    %265 = vector.shape_cast %264 : vector<8xf32> to vector<8x1xf32>
    %cst_159 = arith.constant 3.200000e+01 : f32
    %266 = vector.broadcast %cst_159 : f32 to vector<8x1xf32>
    %267 = arith.divf %265, %266 : vector<8x1xf32>
    %268 = vector.broadcast %267 : vector<8x1xf32> to vector<8x32xf32>
    %269 = arith.subf %263, %268 : vector<8x32xf32>
    %270 = arith.mulf %269, %269 : vector<8x32xf32>
    %cst_160 = arith.constant dense<0.000000e+00> : vector<8xf32>
    %271 = vector.multi_reduction <add>, %270, %cst_160 [1] : vector<8x32xf32> to vector<8xf32>
    %272 = vector.shape_cast %271 : vector<8xf32> to vector<8x1xf32>
    %cst_161 = arith.constant 3.200000e+01 : f32
    %273 = vector.broadcast %cst_161 : f32 to vector<8x1xf32>
    %274 = arith.divf %272, %273 : vector<8x1xf32>
    %cst_162 = arith.constant 9.99999996E-13 : f32
    %275 = vector.broadcast %cst_162 : f32 to vector<8x1xf32>
    %276 = arith.addf %274, %275 : vector<8x1xf32>
    %277 = math.rsqrt %276 : vector<8x1xf32>
    %278 = vector.broadcast %277 : vector<8x1xf32> to vector<8x32xf32>
    %279 = arith.mulf %269, %278 : vector<8x32xf32>
    %280 = vector.broadcast %201 : vector<1x32xf32> to vector<8x32xf32>
    %281 = arith.mulf %279, %280 : vector<8x32xf32>
    %282 = vector.broadcast %203 : vector<1x32xf32> to vector<8x32xf32>
    %283 = arith.addf %281, %282 : vector<8x32xf32>
    %cst_163 = arith.constant dense<0.000000e+00> : vector<8x64xf32>
    %284 = tpu.matmul %283, %211, %cst_163 {dimension_numbers = #tpu.dot_dimension_numbers<[1], [0], [0], [1], [0, 0, 1, 1], [], []>} : vector<8x32xf32>, vector<32x64xf32>, vector<8x64xf32> -> vector<8x64xf32>
    %285 = vector.broadcast %213 : vector<1x64xf32> to vector<8x64xf32>
    %286 = arith.addf %284, %285 : vector<8x64xf32>
    %cst_164 = arith.constant 5.000000e-01 : f32
    %287 = vector.broadcast %cst_164 : f32 to vector<8x64xf32>
    %288 = arith.mulf %287, %286 : vector<8x64xf32>
    %cst_165 = arith.constant 4.471500e-02 : f32
    %289 = vector.broadcast %cst_165 : f32 to vector<8x64xf32>
    %290 = arith.mulf %289, %286 : vector<8x64xf32>
    %291 = arith.mulf %290, %286 : vector<8x64xf32>
    %292 = arith.mulf %291, %286 : vector<8x64xf32>
    %293 = arith.addf %286, %292 : vector<8x64xf32>
    %cst_166 = arith.constant 0.797884583 : f32
    %294 = vector.broadcast %cst_166 : f32 to vector<8x64xf32>
    %295 = arith.mulf %294, %293 : vector<8x64xf32>
    %296 = math.tanh %295 : vector<8x64xf32>
    %cst_167 = arith.constant 1.000000e+00 : f32
    %297 = vector.broadcast %cst_167 : f32 to vector<8x64xf32>
    %298 = arith.addf %297, %296 : vector<8x64xf32>
    %299 = arith.mulf %288, %298 : vector<8x64xf32>
    %cst_168 = arith.constant dense<0.000000e+00> : vector<8x32xf32>
    %300 = tpu.matmul %299, %215, %cst_168 {dimension_numbers = #tpu.dot_dimension_numbers<[1], [0], [0], [1], [0, 0, 1, 1], [], []>} : vector<8x64xf32>, vector<64x32xf32>, vector<8x32xf32> -> vector<8x32xf32>
    %301 = vector.broadcast %205 : vector<1x32xf32> to vector<8x32xf32>
    %302 = arith.addf %300, %301 : vector<8x32xf32>
    %303 = arith.addf %283, %302 : vector<8x32xf32>
    %cst_169 = arith.constant dense<0.000000e+00> : vector<8xf32>
    %304 = vector.multi_reduction <add>, %303, %cst_169 [1] : vector<8x32xf32> to vector<8xf32>
    %305 = vector.shape_cast %304 : vector<8xf32> to vector<8x1xf32>
    %cst_170 = arith.constant 3.200000e+01 : f32
    %306 = vector.broadcast %cst_170 : f32 to vector<8x1xf32>
    %307 = arith.divf %305, %306 : vector<8x1xf32>
    %308 = vector.broadcast %307 : vector<8x1xf32> to vector<8x32xf32>
    %309 = arith.subf %303, %308 : vector<8x32xf32>
    %310 = arith.mulf %309, %309 : vector<8x32xf32>
    %cst_171 = arith.constant dense<0.000000e+00> : vector<8xf32>
    %311 = vector.multi_reduction <add>, %310, %cst_171 [1] : vector<8x32xf32> to vector<8xf32>
    %312 = vector.shape_cast %311 : vector<8xf32> to vector<8x1xf32>
    %cst_172 = arith.constant 3.200000e+01 : f32
    %313 = vector.broadcast %cst_172 : f32 to vector<8x1xf32>
    %314 = arith.divf %312, %313 : vector<8x1xf32>
    %cst_173 = arith.constant 9.99999996E-13 : f32
    %315 = vector.broadcast %cst_173 : f32 to vector<8x1xf32>
    %316 = arith.addf %314, %315 : vector<8x1xf32>
    %317 = math.rsqrt %316 : vector<8x1xf32>
    %318 = vector.broadcast %317 : vector<8x1xf32> to vector<8x32xf32>
    %319 = arith.mulf %309, %318 : vector<8x32xf32>
    %320 = vector.broadcast %207 : vector<1x32xf32> to vector<8x32xf32>
    %321 = arith.mulf %319, %320 : vector<8x32xf32>
    %322 = vector.broadcast %209 : vector<1x32xf32> to vector<8x32xf32>
    %323 = arith.addf %321, %322 : vector<8x32xf32>
    %c2_174 = arith.constant 2 : index
    %c0_175 = arith.constant 0 : index
    %c0_176 = arith.constant 0 : index
    %324 = vector.load %arg7[%c2_174, %c0_175, %c0_176] : memref<3x8x32xf32, #tpu.memory_space<vmem>>, vector<1x8x32xf32>
    %325 = vector.shape_cast %324 : vector<1x8x32xf32> to vector<8x32xf32>
    %326 = vector.shape_cast %323 : vector<8x32xf32> to vector<1x8x32xf32>
    tpu.vector_store %arg7[%c2_174, %c0_175, %c0_176], %326 {strides = array<i32>} : memref<3x8x32xf32, #tpu.memory_space<vmem>>, vector<1x8x32xf32>,
    return
  }
}

</mosaic_0001>

<bundles_post_ra>
// kernel: bert_text_embed.1
= control target key start
LH: loop header
LB: loop body
LE: loop exit
PB: predicated region body
PF: predicated region fallthrough
CT: control target
= control target key end

     0   :  { %12 = vsyncpa [#allocation3], 0  ;;  %s977_s27 = smov [#allocation2]   ;;  %s978_s29 = smov 128   ;;  %s1258_s0 = inlined_call_operand.vmem [shape: f32[8,32], index: 0, kind: input, shape index: {}]   ;;  %s1259_s1 = inlined_call_operand.vmem [shape: f32[2,32], index: 1, kind: input, shape index: {}]   ;;  %s1260_s2 = inlined_call_operand.hbm [shape: f32[2,4,32,32], index: 2, kind: input, shape index: {}]   ;;  %s1261_s3 = inlined_call_operand.vmem [shape: f32[2,32,64], index: 3, kind: input, shape index: {}]   ;;  %s1262_s4 = inlined_call_operand.vmem [shape: f32[2,64,32], index: 4, kind: input, shape index: {}]   ;;  %s1263_s5 = inlined_call_operand.vmem [shape: f32[2,1,64], index: 5, kind: input, shape index: {}]   ;;  %s1264_s6 = inlined_call_operand.vmem [shape: f32[2,9,32], index: 6, kind: input, shape index: {}]   ;;  %s1265_s7 = inlined_call_operand.vmem [shape: f32[3,8,32], index: 7, kind: output, shape index: {}]  }
   0x1   :  { %s21_s26 = sshll.u32 %s1260_s2, 4  ;;  %s23_s28 = sshll.u32 %s977_s27, 4  ;;  %s22_s26 = int_to_ptr.hbm [resolvable:$true] %s21_s26  ;;  %s24_s28 = int_to_ptr.vmem [resolvable:$true] %s23_s28 }
   0x2   :  { %s979_s30 = smov 8  }
   0x3   :  { %29 = dma.hbm_to_vmem [thread:$0]  %s22_s26, 4096, %s24_s28, [#allocation3], %s978_s29, %s978_s29, %s979_s30  }
   0x4   :  { %975 = dma.done.wait [#allocation3], 4096  }
   0x5   :  { %976 = vsyncadd [#allocation3], 4294963200  ;;  %vm57_vm0 = vcmask 261120   ;;  %v54_v0 = vld [vmem:[%s1258_s0] sm:$0xff]  ;;  %v980_v2 = vmov 32.0   ;;  %v95_v14 = vld [vmem:[#allocation2 + $0x18] sm:$0xff]  ;;  %v42_v41 = vlaneseq }
   0x6   :  { %v58_v1 = vsel %vm57_vm0, %v54_v0, 0.0  ;;  %919 = vrcp.f32 %v980_v2  ;;  %v100_v15 = vld [vmem:[#allocation2 + $0x38] sm:$0xff]  ;;  %149 = vmatpush.msra.mxu0 %v95_v14  ;;  %v94_v17 = vld [vmem:[#allocation2 + $0x10] sm:$0xff]  ;;  %v93_v20 = vld [vmem:[#allocation2 + $0x8] sm:$0xff]  ;;  %v981_v44 = vmov 0.0   ;;  %vm228_vm9 = vcmask 64512  }
   0x7   :  { %59 = vadd.xlane.f32.xlu0 %v58_v1  ;;  %v105_v16 = vld [vmem:[#allocation2 + $0x58] sm:$0xff]  ;;  %170 = vmatpush.msra.mxu1 %v100_v15  ;;  %v99_v18 = vld [vmem:[#allocation2 + $0x30] sm:$0xff]  ;;  %v98_v21 = vld [vmem:[#allocation2 + $0x28] sm:$0xff]  ;;  %v43_v42 = vand.u32 127, %v42_v41  ;;  %vm410_vm13 = vcmask 523264  }
   0x8   :  { %191 = vmatpush.msra.mxu2 %v105_v16  ;;  %v104_v19 = vld [vmem:[#allocation2 + $0x50] sm:$0xff]  ;;  %150 = vmatpush.msra.mxu0 %v94_v17  ;;  %v103_v22 = vld [vmem:[#allocation2 + $0x48] sm:$0xff]  ;;  %v92_v23 = vld [vmem:[#allocation2] sm:$0xff] }
   0x9   :  { %171 = vmatpush.msra.mxu1 %v99_v18  ;;  %v97_v24 = vld [vmem:[#allocation2 + $0x20] sm:$0xff]  ;;  %vm49_vm5 = vcmp.ge.s32.totalorder %v43_v42, 16  ;;  %vm50_vm6 = vcmp.lt.s32.totalorder %v43_v42, 32  ;;  %vm45_vm7 = vcmp.lt.s32.totalorder %v43_v42, 16  ;;  %v110_v18 = vld [vmem:[#allocation2 + $0x78] sm:$0xff] }
   0xa   :  { %192 = vmatpush.msra.mxu2 %v104_v19  ;;  %151 = vmatpush.msra.mxu0 %v93_v20  ;;  %v102_v25 = vld [vmem:[#allocation2 + $0x40] sm:$0xff]  ;;  %vm51_vm8 = vmand %vm49_vm5, %vm50_vm6  ;;  %v1056_v45 = vsel %vm45_vm7, 1.0, %v981_v44  ;;  %v109_v19 = vld [vmem:[#allocation2 + $0x70] sm:$0xff] }
   0xb   :  { %172 = vmatpush.msra.mxu1 %v98_v21  ;;  %v897_v35 = vld [vmem:[%s1259_s1] ss:$0 sm:$0xff]  ;;  %v898_v38 = vld [vmem:[%s1259_s1 + $0x1] ss:$0 sm:$0xff]  ;;  %v1058_v47 = vsel %vm51_vm8, 1.0, %v981_v44  ;;  %v108_v20 = vld [vmem:[#allocation2 + $0x68] sm:$0xff] }
   0xc   :  { %v920_v3 = vpop.eup %919  ;;  %193 = vmatpush.msra.mxu2 %v103_v22  ;;  %152 = vmatpush.msra.mxu0 %v92_v23  ;;  %v900_v43 = vld [vmem:[%s1264_s6 + $0x1] ss:$0 sm:$0xff]  ;;  %v899_v49 = vld [vmem:[%s1264_s6] ss:$0 sm:$0xff]  ;;  %v901_v53 = vld [vmem:[%s1264_s6 + $0x2] ss:$0 sm:$0xff] }
   0xd   :  { %v62_v4 = vmul.f32 32.0, %v920_v3  ;;  %vm66_vm1 = vweird.f32 %v920_v3  ;;  %173 = vmatpush.msra.mxu1 %v97_v24  ;;  %v107_v21 = vld [vmem:[#allocation2 + $0x60] sm:$0xff] }
   0xe   :  { %194 = vmatpush.msra.mxu2 %v102_v25  ;;  %v902_v25 = vld [vmem:[%s1264_s6 + $0x3] ss:$0 sm:$0xff] }
   0xf   :  { %v63_v5 = vsub.f32 1.0, %v62_v4 }
  0x10   :  { %339 = vmatpush.msrb.mxu2 %v110_v18 }
  0x11   :  { %v64_v6 = vmul.f32 %v920_v3, %v63_v5 }
  0x12   :  { %340 = vmatpush.msrb.mxu2 %v109_v19 }
  0x13   :  { %v65_v7 = vadd.f32 %v920_v3, %v64_v6 }
  0x14   :  { %341 = vmatpush.msrb.mxu2 %v108_v20 }
  0x15   :  { %v1029_v8 = vsel %vm66_vm1, %v920_v3, %v65_v7 }
  0x16   :  { %342 = vmatpush.msrb.mxu2 %v107_v21 }
  0x7a   :  { %v60_v9 = vpop.xlane.xlu0 %59 }
  0x7b   :  { %v68_v10 = vmul.f32 %v1029_v8, %v60_v9 }
  0x7d   :  { %v69_v11 = vsub.f32 %v54_v0, %v68_v10 }
  0x7f   :  { %v70_v12 = vmul.f32 %v69_v11, %v69_v11 }
  0x81   :  { %v71_v13 = vsel %vm57_vm0, %v70_v12, 0.0 }
  0x82   :  { %72 = vadd.xlane.f32.xlu0 %v71_v13 }
  0xf5   :  { %v73_v26 = vpop.xlane.xlu0 %72 }
  0xf6   :  { %v74_v27 = vmul.f32 %v73_v26, %v1029_v8 }
  0xf8   :  { %v75_v28 = vadd.f32 1e-12, %v74_v27 }
  0xfa   :  { %921 = vrsqrt.f32 %v75_v28  ;;  %vm82_vm3 = vweird.f32 %v75_v28 }
 0x100   :  { %v922_v29 = vpop.eup %921 }
 0x101   :  { %v77_v30 = vmul.f32 %v922_v29, %v75_v28  ;;  %vm83_vm2 = vweird.f32 %v922_v29 }
 0x102   :  { %vm84_vm4 = vmor %vm82_vm3, %vm83_vm2 }
 0x103   :  { %v78_v31 = vmul.f32 %v922_v29, %v77_v30 }
 0x105   :  { %v79_v32 = vmul.f32 0.5, %v78_v31 }
 0x107   :  { %v80_v33 = vsub.f32 1.5, %v79_v32 }
 0x109   :  { %v81_v34 = vmul.f32 %v922_v29, %v80_v33 }
 0x10b   :  { %v85_v36 = vsel %vm84_vm4, %v922_v29, %v81_v34 }
 0x10c   :  { %v86_v37 = vmul.f32 %v85_v36, %v69_v11  ;;  %v122_v36 = vld [vmem:[%s1261_s3 + $0x10] sm:$0xff] }
 0x10e   :  { %v88_v39 = vmul.f32 %v897_v35, %v86_v37  ;;  %v123_v35 = vld [vmem:[%s1261_s3 + $0x18] sm:$0xff]  ;;  %v121_v37 = vld [vmem:[%s1261_s3 + $0x8] sm:$0xff] }
 0x110   :  { %v1040_v40 = vadd.f32 %v898_v38, %v88_v39  ;;  %v120_v38 = vld [vmem:[%s1261_s3] sm:$0xff] }
 0x112   :  { %91 = vst.msk [vmem:[%s1265_s7] sm:$0xff] %vm57_vm0, %v1040_v40  ;;  %844 = vmatmul.msk.f32.vlgmr.msra.gmra.mxu0 %vm57_vm0, %v1040_v40  ;;  %845 = vmatmul.msk.f32.vlgmr.msra.gmra.mxu1 %vm57_vm0, %v1040_v40 }
 0x113   :  { %846 = vmatmul.msk.f32.vlgmr.msra.gmra.mxu2 %vm57_vm0, %v1040_v40 }
 0x18f   :  { %v175_v46 = vpop.f32.mrf.mxu1  ;;  %v154_v50 = vpop.f32.mrf.mxu0 }
 0x190   :  { %v176_v48 = vadd.f32 %v900_v43, %v175_v46  ;;  %v155_v54 = vadd.f32 %v899_v49, %v154_v50  ;;  %v903_v50 = vld [vmem:[%s1264_s6 + $0x4] ss:$0 sm:$0xff] }
 0x192   :  { %v199_v51 = vmul.f32 %v1056_v45, %v176_v48  ;;  %v240_v52 = vmul.f32 %v1058_v47, %v176_v48 }
 0x194   :  { %847 = vmatpush.xpose.msk.msrb.mxu0 %vm57_vm0, %v199_v51  ;;  %849 = vmatpush.xpose.msk.msra.mxu3 %vm57_vm0, %v240_v52 }
 0x196   :  { %v196_v55 = vpop.f32.mrf.mxu2 }
 0x197   :  { %v197_v56 = vadd.f32 %v901_v53, %v196_v55  ;;  %848 = vmatmul.msk.f32.vlgmr.msrb.gmra.mxu0 %vm57_vm0, %v155_v54  ;;  %850 = vmatmul.msk.f32.vlgmr.msra.gmra.mxu3 %vm57_vm0, %v155_v54  ;;  %v904_v53 = vld [vmem:[%s1264_s6 + $0x5] ss:$0 sm:$0xff] }
 0x198   :  { %392 = vmatpush.msrb.mxu3 %v123_v35 }
 0x199   :  { %v241_v57 = vmul.f32 %v1058_v47, %v197_v56  ;;  %v200_v58 = vmul.f32 %v1056_v45, %v197_v56  ;;  %v132_v56 = vld [vmem:[%s1262_s4 + $0x38] sm:$0xff] }
 0x19a   :  { %393 = vmatpush.msrb.mxu3 %v122_v36 }
 0x19b   :  { %295 = vmatpush.msra.mxu0 %v241_v57  ;;  %318 = vmatpush.msrb.mxu1 %v200_v58  ;;  %v131_v57 = vld [vmem:[%s1262_s4 + $0x30] sm:$0xff]  ;;  %v130_v58 = vld [vmem:[%s1262_s4 + $0x28] sm:$0xff] }
 0x19c   :  { %394 = vmatpush.msrb.mxu3 %v121_v37 }
 0x19d   :  { %422 = vmatpush.msrb.mxu0 %v132_v56 }
 0x19e   :  { %395 = vmatpush.msrb.mxu3 %v120_v38 }
 0x19f   :  { %423 = vmatpush.msrb.mxu0 %v131_v57  ;;  %v909_v57 = vld [vmem:[%s1264_s6 + $0x10] ss:$0 sm:$0xff] }
 0x1a1   :  { %424 = vmatpush.msrb.mxu0 %v130_v58 }
 0x214   :  { %v224_v59 = vpop.f32.mrf.mxu0 }
 0x215   :  { %v227_v60 = vmul.f32 0.25, %v224_v59  ;;  %v129_v59 = vld [vmem:[%s1262_s4 + $0x20] sm:$0xff] }
 0x216   :  { %425 = vmatpush.msrb.mxu0 %v129_v59 }
 0x217   :  { %v229_v61 = vsel %vm228_vm9, %v227_v60, -inf }
 0x218   :  { %230 = vmax.xlane.f32.xlu1 %v229_v61  ;;  %v127_v61 = vld [vmem:[%s1262_s4 + $0x10] sm:$0xff] }
 0x21a   :  { %v262_v62 = vpop.f32.mrf.mxu3 }
 0x21b   :  { %v265_v63 = vmul.f32 0.25, %v262_v62  ;;  %v126_v62 = vld [vmem:[%s1262_s4 + $0x8] sm:$0xff] }
 0x21d   :  { %v266_v0 = vsel %vm228_vm9, %v265_v63, -inf }
 0x220   :  { %267 = vmax.xlane.f32.xlu1 %v266_v0  ;;  %v905_v0 = vld [vmem:[%s1263_s5] ss:$0 sm:$0xff] }
 0x28b   :  { %v231_v1 = vpop.xlane.xlu1 %230 }
 0x28c   :  { %v232_v2 = vsub.f32 %v227_v60, %v231_v1  ;;  %v128_v60 = vld [vmem:[%s1262_s4 + $0x18] sm:$0xff] }
 0x28d   :  { %426 = vmatpush.msrb.mxu0 %v128_v60 }
 0x28e   :  { %v233_v3 = vmul.f32 1.442695, %v232_v2 }
 0x28f   :  { %427 = vmatpush.msrb.mxu0 %v127_v61 }
 0x290   :  { %923 = vpow2.f32 %v233_v3 }
 0x291   :  { %428 = vmatpush.msrb.mxu0 %v126_v62 }
 0x293   :  { %v268_v4 = vpop.xlane.xlu1 %267 }
 0x294   :  { %v269_v5 = vsub.f32 %v265_v63, %v268_v4  ;;  %v125_v63 = vld [vmem:[%s1262_s4] sm:$0xff] }
 0x295   :  { %429 = vmatpush.msrb.mxu0 %v125_v63 }
 0x296   :  { %v924_v6 = vpop.eup %923  ;;  %v270_v7 = vmul.f32 1.442695, %v269_v5 }
 0x297   :  { %v235_v9 = vsel %vm228_vm9, %v924_v6, 0.0 }
 0x298   :  { %925 = vpow2.f32 %v270_v7  ;;  %236 = vadd.xlane.f32.xlu2 %v235_v9 }
 0x29e   :  { %v926_v10 = vpop.eup %925 }
 0x29f   :  { %v272_v11 = vsel %vm228_vm9, %v926_v10, 0.0 }
 0x2a0   :  { %273 = vadd.xlane.f32.xlu2 %v272_v11 }
 0x30b   :  { %v237_v12 = vpop.xlane.xlu2 %236 }
 0x30c   :  { %927 = vrcp.f32 %v237_v12 }
 0x312   :  { %v928_v13 = vpop.eup %927 }
 0x313   :  { %v274_v14 = vpop.xlane.xlu2 %273  ;;  %v239_v15 = vmul.f32 %v928_v13, %v924_v6  ;;  %v906_v13 = vld [vmem:[%s1264_s6 + $0x6] ss:$0 sm:$0xff] }
 0x314   :  { %929 = vrcp.f32 %v274_v14 }
 0x315   :  { %852 = vmatmul.msk.f32.vlgmr.msrb.gmra.mxu1 %vm228_vm9, %v239_v15 }
 0x31a   :  { %v930_v16 = vpop.eup %929 }
 0x31b   :  { %v276_v17 = vmul.f32 %v930_v16, %v926_v10 }
 0x31d   :  { %851 = vmatmul.msk.f32.vlgmr.msra.gmra.mxu0 %vm228_vm9, %v276_v17 }
 0x392   :  { %v320_v22 = vpop.f32.mrf.mxu1 }
 0x39a   :  { %v297_v23 = vpop.f32.mrf.mxu0 }
 0x39b   :  { %v321_v24 = vadd.f32 %v320_v22, %v297_v23  ;;  %v467_v23 = vld [vmem:[#allocation2 + $0x98] sm:$0xff] }
 0x39c   :  { %525 = vmatpush.msra.mxu1 %v467_v23  ;;  %v481_v23 = vld [vmem:[#allocation2 + $0xf0] sm:$0xff] }
 0x39d   :  { %853 = vmatmul.msk.f32.vlgmr.msrb.gmra.mxu2 %vm57_vm0, %v321_v24  ;;  %v472_v24 = vld [vmem:[#allocation2 + $0xb8] sm:$0xff] }
 0x39e   :  { %546 = vmatpush.msra.mxu2 %v472_v24  ;;  %v480_v24 = vld [vmem:[#allocation2 + $0xe8] sm:$0xff] }
 0x420   :  { %v344_v26 = vpop.f32.mrf.mxu2 }
 0x421   :  { %v345_v27 = vadd.f32 %v902_v25, %v344_v26  ;;  %v477_v25 = vld [vmem:[#allocation2 + $0xd8] sm:$0xff]  ;;  %v466_v26 = vld [vmem:[#allocation2 + $0x90] sm:$0xff] }
 0x422   :  { %567 = vmatpush.msra.mxu3 %v477_v25  ;;  %526 = vmatpush.msra.mxu1 %v466_v26  ;;  %v479_v25 = vld [vmem:[#allocation2 + $0xe0] sm:$0xff] }
 0x423   :  { %v347_v28 = vadd.f32 %v345_v27, %v1040_v40  ;;  %v471_v27 = vld [vmem:[#allocation2 + $0xb0] sm:$0xff] }
 0x424   :  { %547 = vmatpush.msra.mxu2 %v471_v27 }
 0x425   :  { %v348_v29 = vsel %vm57_vm0, %v347_v28, 0.0 }
 0x426   :  { %349 = vadd.xlane.f32.xlu0 %v348_v29  ;;  %v465_v29 = vld [vmem:[#allocation2 + $0x88] sm:$0xff] }
 0x427   :  { %527 = vmatpush.msra.mxu1 %v465_v29  ;;  %v912_v29 = vld [vmem:[%s1264_s6 + $0x13] ss:$0 sm:$0xff] }
 0x499   :  { %v350_v30 = vpop.xlane.xlu0 %349 }
 0x49a   :  { %v351_v31 = vmul.f32 %v350_v30, %v1029_v8  ;;  %v470_v30 = vld [vmem:[#allocation2 + $0xa8] sm:$0xff] }
 0x49b   :  { %548 = vmatpush.msra.mxu2 %v470_v30 }
 0x49c   :  { %v352_v32 = vsub.f32 %v347_v28, %v351_v31  ;;  %v476_v28 = vld [vmem:[#allocation2 + $0xd0] sm:$0xff]  ;;  %v475_v31 = vld [vmem:[#allocation2 + $0xc8] sm:$0xff] }
 0x49d   :  { %568 = vmatpush.msra.mxu3 %v476_v28 }
 0x49e   :  { %v353_v33 = vmul.f32 %v352_v32, %v352_v32 }
 0x49f   :  { %569 = vmatpush.msra.mxu3 %v475_v31 }
 0x4a0   :  { %v354_v34 = vsel %vm57_vm0, %v353_v33, 0.0  ;;  %v469_v33 = vld [vmem:[#allocation2 + $0xa0] sm:$0xff] }
 0x4a1   :  { %355 = vadd.xlane.f32.xlu1 %v354_v34  ;;  %v474_v34 = vld [vmem:[#allocation2 + $0xc0] sm:$0xff]  ;;  %549 = vmatpush.msra.mxu2 %v469_v33 }
 0x4a2   :  { %570 = vmatpush.msra.mxu3 %v474_v34 }
 0x514   :  { %v356_v39 = vpop.xlane.xlu1 %355 }
 0x515   :  { %v357_v40 = vmul.f32 %v356_v39, %v1029_v8 }
 0x517   :  { %v358_v41 = vadd.f32 1e-12, %v357_v40 }
 0x519   :  { %931 = vrsqrt.f32 %v358_v41  ;;  %vm365_vm11 = vweird.f32 %v358_v41 }
 0x51f   :  { %v932_v42 = vpop.eup %931 }
 0x520   :  { %v360_v43 = vmul.f32 %v932_v42, %v358_v41  ;;  %vm366_vm10 = vweird.f32 %v932_v42 }
 0x521   :  { %vm367_vm12 = vmor %vm365_vm11, %vm366_vm10 }
 0x522   :  { %v361_v44 = vmul.f32 %v932_v42, %v360_v43 }
 0x524   :  { %v362_v46 = vmul.f32 0.5, %v361_v44  ;;  %v907_v44 = vld [vmem:[%s1264_s6 + $0x7] ss:$0 sm:$0xff] }
 0x526   :  { %v363_v48 = vsub.f32 1.5, %v362_v46 }
 0x528   :  { %v364_v49 = vmul.f32 %v932_v42, %v363_v48 }
 0x52a   :  { %v368_v51 = vsel %vm367_vm12, %v932_v42, %v364_v49  ;;  %v908_v49 = vld [vmem:[%s1264_s6 + $0x8] ss:$0 sm:$0xff] }
 0x52b   :  { %v369_v52 = vmul.f32 %v368_v51, %v352_v32  ;;  %v464_v32 = vld [vmem:[#allocation2 + $0x80] sm:$0xff] }
 0x52c   :  { %528 = vmatpush.msra.mxu1 %v464_v32 }
 0x52d   :  { %v371_v54 = vmul.f32 %v903_v50, %v369_v52  ;;  %v910_v52 = vld [vmem:[%s1264_s6 + $0x11] ss:$0 sm:$0xff] }
 0x52f   :  { %v373_v55 = vadd.f32 %v904_v53, %v371_v54  ;;  %v911_v53 = vld [vmem:[%s1264_s6 + $0x12] ss:$0 sm:$0xff] }
 0x531   :  { %854 = vmatmul.msk.f32.vlgmr.msrb.gmra.mxu3 %vm57_vm0, %v373_v55 }
 0x5b4   :  { %v397_v1 = vpop.f32.mrf.mxu3 }
 0x5b5   :  { %v398_v2 = vadd.f32 %v905_v0, %v397_v1 }
 0x5b7   :  { %v401_v3 = vmul.f32 0.044715, %v398_v2  ;;  %v400_v10 = vmul.f32 0.5, %v398_v2 }
 0x5b9   :  { %v402_v4 = vmul.f32 %v401_v3, %v398_v2 }
 0x5bb   :  { %v403_v5 = vmul.f32 %v402_v4, %v398_v2 }
 0x5bd   :  { %v404_v6 = vadd.f32 %v403_v5, %v398_v2 }
 0x5bf   :  { %v405_v7 = vmul.f32 0.7978846, %v404_v6 }
 0x5c1   :  { %933 = vtanh.f32 %v405_v7 }
 0x5c7   :  { %v934_v9 = vpop.eup %933 }
 0x5c8   :  { %v407_v11 = vadd.f32 1.0, %v934_v9 }
 0x5ca   :  { %v408_v12 = vmul.f32 %v407_v11, %v400_v10 }
 0x5cc   :  { %855 = vmatmul.msk.f32.vlgmr.msrb.gmra.mxu0 %vm410_vm13, %v408_v12 }
 0x649   :  { %v431_v14 = vpop.f32.mrf.mxu0 }
 0x64a   :  { %v432_v15 = vadd.f32 %v906_v13, %v431_v14 }
 0x64c   :  { %v434_v16 = vadd.f32 %v432_v15, %v373_v55 }
 0x64e   :  { %v435_v17 = vsel %vm57_vm0, %v434_v16, 0.0 }
 0x64f   :  { %436 = vadd.xlane.f32.xlu2 %v435_v17 }
 0x6c2   :  { %v437_v18 = vpop.xlane.xlu2 %436 }
 0x6c3   :  { %v438_v19 = vmul.f32 %v437_v18, %v1029_v8 }
 0x6c5   :  { %v439_v20 = vsub.f32 %v434_v16, %v438_v19 }
 0x6c7   :  { %v440_v21 = vmul.f32 %v439_v20, %v439_v20 }
 0x6c9   :  { %v441_v22 = vsel %vm57_vm0, %v440_v21, 0.0 }
 0x6ca   :  { %442 = vadd.xlane.f32.xlu0 %v441_v22  ;;  %v482_v22 = vld [vmem:[#allocation2 + $0xf8] sm:$0xff] }
 0x73d   :  { %v443_v35 = vpop.xlane.xlu0 %442 }
 0x73e   :  { %v444_v36 = vmul.f32 %v443_v35, %v1029_v8 }
 0x740   :  { %v445_v37 = vadd.f32 1e-12, %v444_v36 }
 0x742   :  { %935 = vrsqrt.f32 %v445_v37  ;;  %vm452_vm15 = vweird.f32 %v445_v37 }
 0x748   :  { %v936_v38 = vpop.eup %935 }
 0x749   :  { %v447_v39 = vmul.f32 %v936_v38, %v445_v37  ;;  %vm453_vm14 = vweird.f32 %v936_v38 }
 0x74a   :  { %vm454_vm1 = vmor %vm452_vm15, %vm453_vm14 }
 0x74b   :  { %v448_v40 = vmul.f32 %v936_v38, %v447_v39  ;;  %v869_v39 = vld [vmem:[%s1261_s3 + $0x38] sm:$0xff] }
 0x74d   :  { %v449_v41 = vmul.f32 0.5, %v448_v40  ;;  %v868_v40 = vld [vmem:[%s1261_s3 + $0x30] sm:$0xff] }
 0x74f   :  { %v450_v42 = vsub.f32 1.5, %v449_v41  ;;  %v867_v41 = vld [vmem:[%s1261_s3 + $0x28] sm:$0xff] }
 0x751   :  { %v451_v43 = vmul.f32 %v936_v38, %v450_v42  ;;  %v866_v42 = vld [vmem:[%s1261_s3 + $0x20] sm:$0xff] }
 0x753   :  { %v455_v46 = vsel %vm454_vm1, %v936_v38, %v451_v43 }
 0x754   :  { %v456_v48 = vmul.f32 %v455_v46, %v439_v20 }
 0x756   :  { %v458_v50 = vmul.f32 %v907_v44, %v456_v48 }
 0x758   :  { %v1149_v51 = vadd.f32 %v908_v49, %v458_v50 }
 0x75a   :  { %856 = vst.msk [vmem:[%s1265_s7 + $0x8] sm:$0xff] %vm57_vm0, %v1149_v51  ;;  %879 = vmatmul.msk.f32.vlgmr.msra.gmra.mxu1 %vm57_vm0, %v1149_v51  ;;  %880 = vmatmul.msk.f32.vlgmr.msra.gmra.mxu2 %vm57_vm0, %v1149_v51 }
 0x75b   :  { %881 = vmatmul.msk.f32.vlgmr.msra.gmra.mxu3 %vm57_vm0, %v1149_v51 }
 0x7d7   :  { %v530_v59 = vpop.f32.mrf.mxu1 }
 0x7d8   :  { %v531_v0 = vadd.f32 %v909_v57, %v530_v59  ;;  %v914_v57 = vld [vmem:[%s1264_s6 + $0x15] ss:$0 sm:$0xff] }
 0x7dd   :  { %v551_v54 = vpop.f32.mrf.mxu2 }
 0x7de   :  { %v552_v55 = vadd.f32 %v910_v52, %v551_v54  ;;  %v572_v56 = vpop.f32.mrf.mxu3  ;;  %v913_v54 = vld [vmem:[%s1264_s6 + $0x14] ss:$0 sm:$0xff] }
 0x7df   :  { %v573_v58 = vadd.f32 %v911_v53, %v572_v56 }
 0x7e0   :  { %v575_v60 = vmul.f32 %v1056_v45, %v552_v55  ;;  %v615_v61 = vmul.f32 %v1058_v47, %v552_v55 }
 0x7e1   :  { %v576_v62 = vmul.f32 %v1056_v45, %v573_v58  ;;  %v616_v63 = vmul.f32 %v1058_v47, %v573_v58 }
 0x7e2   :  { %882 = vmatpush.xpose.msk.msrb.mxu1 %vm57_vm0, %v575_v60  ;;  %884 = vmatpush.xpose.msk.msrb.mxu2 %vm57_vm0, %v615_v61  ;;  %v878_v60 = vld [vmem:[%s1262_s4 + $0x78] sm:$0xff]  ;;  %v877_v61 = vld [vmem:[%s1262_s4 + $0x70] sm:$0xff] }
 0x7e3   :  { %670 = vmatpush.msrb.mxu3 %v616_v63  ;;  %693 = vmatpush.msra.mxu0 %v576_v62  ;;  %v876_v62 = vld [vmem:[%s1262_s4 + $0x68] sm:$0xff]  ;;  %v875_v63 = vld [vmem:[%s1262_s4 + $0x60] sm:$0xff] }
 0x7e5   :  { %883 = vmatmul.msk.f32.vlgmr.msrb.gmra.mxu1 %vm57_vm0, %v531_v0  ;;  %885 = vmatmul.msk.f32.vlgmr.msrb.gmra.mxu2 %vm57_vm0, %v531_v0  ;;  %v874_v0 = vld [vmem:[%s1262_s4 + $0x58] sm:$0xff] }
 0x7e6   :  { %714 = vmatpush.msra.mxu1 %v482_v22  ;;  %767 = vmatpush.msra.mxu2 %v869_v39 }
 0x7e7   :  { %796 = vmatpush.msra.mxu3 %v878_v60 }
 0x7e8   :  { %715 = vmatpush.msra.mxu1 %v481_v23  ;;  %768 = vmatpush.msra.mxu2 %v868_v40 }
 0x7e9   :  { %797 = vmatpush.msra.mxu3 %v877_v61 }
 0x7ea   :  { %716 = vmatpush.msra.mxu1 %v480_v24  ;;  %769 = vmatpush.msra.mxu2 %v867_v41 }
 0x7eb   :  { %798 = vmatpush.msra.mxu3 %v876_v62 }
 0x7ec   :  { %717 = vmatpush.msra.mxu1 %v479_v25  ;;  %770 = vmatpush.msra.mxu2 %v866_v42 }
 0x7ed   :  { %799 = vmatpush.msra.mxu3 %v875_v63 }
 0x7ef   :  { %800 = vmatpush.msra.mxu3 %v874_v0 }
 0x862   :  { %v600_v1 = vpop.f32.mrf.mxu1 }
 0x863   :  { %v603_v2 = vmul.f32 0.25, %v600_v1  ;;  %v873_v1 = vld [vmem:[%s1262_s4 + $0x50] sm:$0xff] }
 0x864   :  { %801 = vmatpush.msra.mxu3 %v873_v1 }
 0x865   :  { %v604_v3 = vsel %vm228_vm9, %v603_v2, -inf }
 0x866   :  { %605 = vmax.xlane.f32.xlu2 %v604_v3  ;;  %v871_v3 = vld [vmem:[%s1262_s4 + $0x40] sm:$0xff] }
 0x868   :  { %v637_v4 = vpop.f32.mrf.mxu2 }
 0x869   :  { %v640_v45 = vmul.f32 0.25, %v637_v4  ;;  %v915_v4 = vld [vmem:[%s1263_s5 + $0x1] ss:$0 sm:$0xff] }
 0x86b   :  { %v641_v47 = vsel %vm228_vm9, %v640_v45, -inf }
 0x86c   :  { %642 = vmax.xlane.f32.xlu1 %v641_v47 }
 0x8d9   :  { %v606_v5 = vpop.xlane.xlu2 %605 }
 0x8da   :  { %v607_v6 = vsub.f32 %v603_v2, %v606_v5  ;;  %v872_v2 = vld [vmem:[%s1262_s4 + $0x48] sm:$0xff] }
 0x8db   :  { %802 = vmatpush.msra.mxu3 %v872_v2 }
 0x8dc   :  { %v608_v7 = vmul.f32 1.442695, %v607_v6 }
 0x8dd   :  { %803 = vmatpush.msra.mxu3 %v871_v3 }
 0x8de   :  { %937 = vpow2.f32 %v608_v7 }
 0x8df   :  { %v643_v9 = vpop.xlane.xlu1 %642 }
 0x8e0   :  { %v644_v10 = vsub.f32 %v640_v45, %v643_v9 }
 0x8e2   :  { %v645_v11 = vmul.f32 1.442695, %v644_v10 }
 0x8e4   :  { %v938_v12 = vpop.eup %937  ;;  %939 = vpow2.f32 %v645_v11 }
 0x8e5   :  { %v610_v13 = vsel %vm228_vm9, %v938_v12, 0.0 }
 0x8e6   :  { %611 = vadd.xlane.f32.xlu1 %v610_v13 }
 0x8ea   :  { %v940_v14 = vpop.eup %939 }
 0x8eb   :  { %v647_v15 = vsel %vm228_vm9, %v940_v14, 0.0 }
 0x8ec   :  { %648 = vadd.xlane.f32.xlu0 %v647_v15  ;;  %v916_v15 = vld [vmem:[%s1264_s6 + $0x16] ss:$0 sm:$0xff] }
 0x959   :  { %v612_v16 = vpop.xlane.xlu1 %611 }
 0x95a   :  { %941 = vrcp.f32 %v612_v16 }
 0x95f   :  { %v649_v17 = vpop.xlane.xlu0 %648 }
 0x960   :  { %v942_v18 = vpop.eup %941  ;;  %943 = vrcp.f32 %v649_v17 }
 0x961   :  { %v614_v19 = vmul.f32 %v942_v18, %v938_v12 }
 0x963   :  { %887 = vmatmul.msk.f32.vlgmr.msra.gmra.mxu0 %vm228_vm9, %v614_v19 }
 0x966   :  { %v944_v20 = vpop.eup %943 }
 0x967   :  { %v651_v21 = vmul.f32 %v944_v20, %v940_v14 }
 0x969   :  { %886 = vmatmul.msk.f32.vlgmr.msrb.gmra.mxu3 %vm228_vm9, %v651_v21 }
 0x9e0   :  { %v695_v26 = vpop.f32.mrf.mxu0 }
 0x9ec   :  { %v672_v27 = vpop.f32.mrf.mxu3 }
 0x9ed   :  { %v696_v28 = vadd.f32 %v695_v26, %v672_v27 }
 0x9ef   :  { %888 = vmatmul.msk.f32.vlgmr.msra.gmra.mxu1 %vm57_vm0, %v696_v28 }
 0xa6c   :  { %v719_v30 = vpop.f32.mrf.mxu1 }
 0xa6d   :  { %v720_v31 = vadd.f32 %v912_v29, %v719_v30 }
 0xa6f   :  { %v722_v32 = vadd.f32 %v720_v31, %v1149_v51 }
 0xa71   :  { %v723_v33 = vsel %vm57_vm0, %v722_v32, 0.0 }
 0xa72   :  { %724 = vadd.xlane.f32.xlu2 %v723_v33 }
 0xae5   :  { %v725_v34 = vpop.xlane.xlu2 %724 }
 0xae6   :  { %v726_v35 = vmul.f32 %v725_v34, %v1029_v8  ;;  %v917_v34 = vld [vmem:[%s1264_s6 + $0x17] ss:$0 sm:$0xff] }
 0xae8   :  { %v727_v36 = vsub.f32 %v722_v32, %v726_v35 }
 0xaea   :  { %v728_v37 = vmul.f32 %v727_v36, %v727_v36 }
 0xaec   :  { %v729_v38 = vsel %vm57_vm0, %v728_v37, 0.0 }
 0xaed   :  { %730 = vadd.xlane.f32.xlu0 %v729_v38 }
 0xb60   :  { %v731_v43 = vpop.xlane.xlu0 %730 }
 0xb61   :  { %v732_v44 = vmul.f32 %v731_v43, %v1029_v8 }
 0xb63   :  { %v733_v46 = vadd.f32 1e-12, %v732_v44 }
 0xb65   :  { %945 = vrsqrt.f32 %v733_v46  ;;  %vm740_vm3 = vweird.f32 %v733_v46 }
 0xb6b   :  { %v946_v48 = vpop.eup %945 }
 0xb6c   :  { %v735_v49 = vmul.f32 %v946_v48, %v733_v46  ;;  %vm741_vm2 = vweird.f32 %v946_v48 }
 0xb6d   :  { %vm742_vm4 = vmor %vm740_vm3, %vm741_vm2 }
 0xb6e   :  { %v736_v50 = vmul.f32 %v946_v48, %v735_v49 }
 0xb70   :  { %v737_v51 = vmul.f32 0.5, %v736_v50 }
 0xb72   :  { %v738_v52 = vsub.f32 1.5, %v737_v51 }
 0xb74   :  { %v739_v53 = vmul.f32 %v946_v48, %v738_v52 }
 0xb76   :  { %v743_v55 = vsel %vm742_vm4, %v946_v48, %v739_v53 }
 0xb77   :  { %v744_v56 = vmul.f32 %v743_v55, %v727_v36 }
 0xb79   :  { %v746_v58 = vmul.f32 %v913_v54, %v744_v56 }
 0xb7b   :  { %v748_v59 = vadd.f32 %v914_v57, %v746_v58 }
 0xb7d   :  { %889 = vmatmul.msk.f32.vlgmr.msra.gmra.mxu2 %vm57_vm0, %v748_v59 }
 0xc00   :  { %v772_v45 = vpop.f32.mrf.mxu2 }
 0xc01   :  { %v773_v47 = vadd.f32 %v915_v4, %v772_v45 }
 0xc03   :  { %v776_v5 = vmul.f32 0.044715, %v773_v47  ;;  %v775_v12 = vmul.f32 0.5, %v773_v47 }
 0xc05   :  { %v777_v6 = vmul.f32 %v776_v5, %v773_v47 }
 0xc07   :  { %v778_v7 = vmul.f32 %v777_v6, %v773_v47 }
 0xc09   :  { %v779_v9 = vadd.f32 %v778_v7, %v773_v47 }
 0xc0b   :  { %v780_v10 = vmul.f32 0.7978846, %v779_v9 }
 0xc0d   :  { %947 = vtanh.f32 %v780_v10 }
 0xc13   :  { %v948_v11 = vpop.eup %947 }
 0xc14   :  { %v782_v13 = vadd.f32 1.0, %v948_v11 }
 0xc16   :  { %v783_v14 = vmul.f32 %v782_v13, %v775_v12 }
 0xc18   :  { %890 = vmatmul.msk.f32.vlgmr.msra.gmra.mxu3 %vm410_vm13, %v783_v14 }
 0xc9b   :  { %v805_v16 = vpop.f32.mrf.mxu3 }
 0xc9c   :  { %v806_v17 = vadd.f32 %v916_v15, %v805_v16 }
 0xc9e   :  { %v808_v18 = vadd.f32 %v806_v17, %v748_v59 }
 0xca0   :  { %v809_v19 = vsel %vm57_vm0, %v808_v18, 0.0 }
 0xca1   :  { %810 = vadd.xlane.f32.xlu1 %v809_v19 }
 0xd14   :  { %v811_v20 = vpop.xlane.xlu1 %810 }
 0xd15   :  { %v812_v21 = vmul.f32 %v811_v20, %v1029_v8 }
 0xd17   :  { %v813_v22 = vsub.f32 %v808_v18, %v812_v21 }
 0xd19   :  { %v814_v23 = vmul.f32 %v813_v22, %v813_v22 }
 0xd1b   :  { %v815_v24 = vsel %vm57_vm0, %v814_v23, 0.0 }
 0xd1c   :  { %816 = vadd.xlane.f32.xlu2 %v815_v24 }
 0xd8f   :  { %v817_v25 = vpop.xlane.xlu2 %816 }
 0xd90   :  { %v818_v26 = vmul.f32 %v817_v25, %v1029_v8  ;;  %v918_v8 = vld [vmem:[%s1264_s6 + $0x18] ss:$0 sm:$0xff] }
 0xd92   :  { %v819_v27 = vadd.f32 1e-12, %v818_v26 }
 0xd94   :  { %949 = vrsqrt.f32 %v819_v27  ;;  %vm826_vm6 = vweird.f32 %v819_v27 }
 0xd9a   :  { %v950_v28 = vpop.eup %949 }
 0xd9b   :  { %v821_v29 = vmul.f32 %v950_v28, %v819_v27  ;;  %vm827_vm5 = vweird.f32 %v950_v28 }
 0xd9c   :  { %vm828_vm7 = vmor %vm826_vm6, %vm827_vm5 }
 0xd9d   :  { %v822_v30 = vmul.f32 %v950_v28, %v821_v29 }
 0xd9f   :  { %v823_v31 = vmul.f32 0.5, %v822_v30 }
 0xda1   :  { %v824_v32 = vsub.f32 1.5, %v823_v31 }
 0xda3   :  { %v825_v33 = vmul.f32 %v950_v28, %v824_v32 }
 0xda5   :  { %v829_v35 = vsel %vm828_vm7, %v950_v28, %v825_v33 }
 0xda6   :  { %v830_v36 = vmul.f32 %v829_v35, %v813_v22 }
 0xda8   :  { %v832_v37 = vmul.f32 %v917_v34, %v830_v36 }
 0xdaa   :  { %v834_v38 = vadd.f32 %v918_v8, %v832_v37 }
 0xdac   :  { %891 = vst.msk [vmem:[%s1265_s7 + $0x10] sm:$0xff] %vm57_vm0, %v834_v38 }
 0xdad   :  { %841 = vsyncpa [#allocation3], 1 }

</bundles_post_ra>
